<compile_context>
chip_gen: v6e
topology: v6e:2x2x1
jax: 0.10.0
libtpu: 0.0.40
codegen_flags: <defaults>
</compile_context>

<pallas_src>
import functools

import jax
import jax.numpy as jnp
from jax.experimental import pallas as pl
from jax.experimental.pallas import tpu as pltpu

LN_EPS = 1e-5  # nn.LayerNorm default


# --------------------------------------------------------------------------
# tiling helpers
# --------------------------------------------------------------------------
def _sublane_pack(dtype):
    # rows per sublane tile: 8 for 4-byte, 16 for 2-byte, 32 for 1-byte dtypes
    return {4: 8, 2: 16, 1: 32}.get(jnp.dtype(dtype).itemsize, 8)


def _choose_block_rows(n_rows, hidden, dtype, target_bytes=1 << 20):
    """Row-tile size: ~1 MiB per (rows, hidden) tile, aligned to the sublane
    pack, never larger than the (rounded-up) problem.  ~1 MiB tiles amortize
    the ~0.35 us/step pipeline overhead and keep the double-buffered working
    set well under the scoped-VMEM default on v5e/v6e/v7x."""
    pack = _sublane_pack(dtype)
    itemsize = jnp.dtype(dtype).itemsize
    rows = max(pack, (target_bytes // (hidden * itemsize)) // pack * pack)
    padded_rows = -(-n_rows // pack) * pack
    return int(min(rows, padded_rows))


def _pad_rows(x2d, block_rows):
    rows = x2d.shape[0]
    padded = -(-rows // block_rows) * block_rows
    if padded != rows:
        x2d = jnp.pad(x2d, ((0, padded - rows), (0, 0)))
    return x2d


# --------------------------------------------------------------------------
# in-kernel counter-based PRNG (no pltpu.prng_*, portable to interpret mode)
# --------------------------------------------------------------------------
def _rotl32(x, amount):
    return (x << jnp.uint32(amount)) | (x >> jnp.uint32(32 - amount))


def _dropout_bits(seed_i32, row_start_i32, shape):
    """uint32 random bits, a pure function of (seed, absolute row, column).

    Threefry-2x32-style mixer using only add / xor / rotate, so it lowers on
    the TPU VPU and in interpret mode.  Being keyed on the absolute element
    index makes the mask independent of the grid/block decomposition.
    """
    rows = (jax.lax.broadcasted_iota(jnp.int32, shape, 0)
            + row_start_i32).astype(jnp.uint32)
    cols = jax.lax.broadcasted_iota(jnp.int32, shape, 1).astype(jnp.uint32)

    k0 = seed_i32.astype(jnp.uint32)
    k1 = jnp.uint32(0xBB67AE85)
    k2 = k0 ^ k1 ^ jnp.uint32(0x1BD11BDA)
    keys = (k0, k1, k2)

    x0 = rows + k0
    x1 = cols + k1
    rots = (13, 15, 26, 6, 17, 29, 16, 24)
    for i, rot in enumerate(rots):
        x0 = x0 + x1
        x1 = _rotl32(x1, rot) ^ x0
        if (i + 1) % 4 == 0:
            j = (i + 1) // 4
            x0 = x0 + keys[j % 3]
            x1 = x1 + keys[(j + 1) % 3] + jnp.uint32(j)
    return x0 ^ x1


def _apply_dropout(y, seed_ref, block_rows, rate):
    """Inverted dropout with static rate in (0, 1)."""
    row_start = pl.program_id(0) * block_rows
    bits = _dropout_bits(seed_ref[0], row_start, y.shape)
    threshold = jnp.uint32(min(int(rate * 4294967296.0), 0xFFFFFFFF))
    keep = bits >= threshold
    return jnp.where(keep, y * (1.0 / (1.0 - rate)), 0.0)


# --------------------------------------------------------------------------
# fused fast path: LayerNorm -> Linear (MXU) -> dropout -> residual
# --------------------------------------------------------------------------
def _fused_kernel(x_ref, gamma_ref, beta_ref, w_ref, b_ref, seed_ref, o_ref,
                  *, rate, training, block_rows):
    x = x_ref[...].astype(jnp.float32)
    mean = jnp.mean(x, axis=-1, keepdims=True)
    xc = x - mean
    var = jnp.mean(xc * xc, axis=-1, keepdims=True)
    normed = (xc * jax.lax.rsqrt(var + LN_EPS)
              * gamma_ref[...].astype(jnp.float32)
              + beta_ref[...].astype(jnp.float32))
    # Linear sublayer on the MXU; W (H x H) stays VMEM-resident across the grid
    # (its block index never changes).  For bf16 activations, cast inputs to
    # bf16 here for 2-4x MXU throughput on v6e/v7x (f32 kept for the check).
    y = jnp.dot(normed, w_ref[...].astype(jnp.float32),
                preferred_element_type=jnp.float32,
                precision=jax.lax.Precision.HIGHEST)
    y = y + b_ref[...].astype(jnp.float32)
    if training and rate >= 1.0:
        y = jnp.zeros_like(y)          # everything dropped
    elif training and rate > 0.0:
        y = _apply_dropout(y, seed_ref, block_rows, rate)
    o_ref[...] = (x + y).astype(o_ref.dtype)


def sublayer_connection_linear(x, w, b, gamma, beta, *, dropout_ratio,
                               training=False, seed=0):
    """Fused fast path: x + dropout(LayerNorm(x) @ W + b).  x: (B, S, H)."""
    B, S, H = x.shape
    rows = B * S
    block_rows = _choose_block_rows(rows, H, x.dtype)
    x2d = _pad_rows(x.reshape(rows, H), block_rows)
    padded = x2d.shape[0]

    kernel = functools.partial(_fused_kernel, rate=float(dropout_ratio),
                               training=bool(training), block_rows=block_rows)
    seed_arr = jnp.asarray([seed], dtype=jnp.int32)

    out = pl.pallas_call(
        kernel,
        out_shape=jax.ShapeDtypeStruct((padded, H), x.dtype),
        grid=(padded // block_rows,),
        in_specs=[
            pl.BlockSpec((block_rows, H), lambda i: (i, 0)),   # x
            pl.BlockSpec((1, H), lambda i: (0, 0)),            # gamma
            pl.BlockSpec((1, H), lambda i: (0, 0)),            # beta
            pl.BlockSpec((H, H), lambda i: (0, 0)),            # W (VMEM resident)
            pl.BlockSpec((1, H), lambda i: (0, 0)),            # bias
            pl.BlockSpec(memory_space=pltpu.MemorySpace.SMEM), # seed scalar
        ],
        out_specs=pl.BlockSpec((block_rows, H), lambda i: (i, 0)),
        compiler_params=pltpu.CompilerParams(
            dimension_semantics=("parallel",)),
    )(x2d, gamma.reshape(1, H), beta.reshape(1, H), w, b.reshape(1, H), seed_arr)
    return out[:rows].reshape(B, S, H)


# --------------------------------------------------------------------------
# generic path (opaque sublayer callable): LN kernel -> sublayer -> res+dropout
# --------------------------------------------------------------------------
def _layernorm_kernel(x_ref, gamma_ref, beta_ref, o_ref):
    x = x_ref[...].astype(jnp.float32)
    mean = jnp.mean(x, axis=-1, keepdims=True)
    xc = x - mean
    var = jnp.mean(xc * xc, axis=-1, keepdims=True)
    y = (xc * jax.lax.rsqrt(var + LN_EPS)
         * gamma_ref[...].astype(jnp.float32)
         + beta_ref[...].astype(jnp.float32))
    o_ref[...] = y.astype(o_ref.dtype)


def layernorm_pallas(x2d, gamma, beta, *, block_rows):
    rows, H = x2d.shape
    return pl.pallas_call(
        _layernorm_kernel,
        out_shape=jax.ShapeDtypeStruct((rows, H), x2d.dtype),
        grid=(rows // block_rows,),
        in_specs=[
            pl.BlockSpec((block_rows, H), lambda i: (i, 0)),
            pl.BlockSpec((1, H), lambda i: (0, 0)),
            pl.BlockSpec((1, H), lambda i: (0, 0)),
        ],
        out_specs=pl.BlockSpec((block_rows, H), lambda i: (i, 0)),
        compiler_params=pltpu.CompilerParams(
            dimension_semantics=("parallel",)),
    )(x2d, gamma.reshape(1, H), beta.reshape(1, H))


def _residual_dropout_kernel(x_ref, y_ref, seed_ref, o_ref,
                             *, rate, training, block_rows):
    x = x_ref[...].astype(jnp.float32)
    y = y_ref[...].astype(jnp.float32)
    if training and rate >= 1.0:
        y = jnp.zeros_like(y)
    elif training and rate > 0.0:
        y = _apply_dropout(y, seed_ref, block_rows, rate)
    o_ref[...] = (x + y).astype(o_ref.dtype)


def residual_dropout_pallas(x2d, y2d, *, rate, training, seed, block_rows):
    rows, H = x2d.shape
    kernel = functools.partial(_residual_dropout_kernel, rate=float(rate),
                               training=bool(training), block_rows=block_rows)
    seed_arr = jnp.asarray([seed], dtype=jnp.int32)
    return pl.pallas_call(
        kernel,
        out_shape=jax.ShapeDtypeStruct((rows, H), x2d.dtype),
        grid=(rows // block_rows,),
        in_specs=[
            pl.BlockSpec((block_rows, H), lambda i: (i, 0)),
            pl.BlockSpec((block_rows, H), lambda i: (i, 0)),
            pl.BlockSpec(memory_space=pltpu.MemorySpace.SMEM),
        ],
        out_specs=pl.BlockSpec((block_rows, H), lambda i: (i, 0)),
        compiler_params=pltpu.CompilerParams(
            dimension_semantics=("parallel",)),
    )(x2d, y2d, seed_arr)


def sublayer_connection(x, sublayer_fn, gamma, beta, *, dropout_ratio,
                        training=False, seed=0):
    """Generic path for an opaque sublayer: x + dropout(sublayer(LN(x)))."""
    B, S, H = x.shape
    rows = B * S
    block_rows = _choose_block_rows(rows, H, x.dtype)
    x2d = _pad_rows(x.reshape(rows, H), block_rows)
    normed = layernorm_pallas(x2d, gamma, beta, block_rows=block_rows)
    sub = sublayer_fn(normed[:rows].reshape(B, S, H)).reshape(rows, H)
    sub = _pad_rows(sub, block_rows)
    out = residual_dropout_pallas(x2d, sub, rate=dropout_ratio,
                                  training=training, seed=seed,
                                  block_rows=block_rows)
    return out[:rows].reshape(B, S, H)


# --------------------------------------------------------------------------
# demo / self-check
# --------------------------------------------------------------------------
if __name__ == "__main__":
    # config: hidden_dim=128, dropout_ratio=0.1.  S=9 -> 18 rows, exercises the
    # ragged-row padding path (18 is not a multiple of the chosen block).
    B, S, H = 2, 9, 128
    dropout_ratio = 0.1

    key = jax.random.PRNGKey(0)
    kx, kg, kb, kw, kbi = jax.random.split(key, 5)

    x = jax.random.normal(kx, (B, S, H), dtype=jnp.float32)
    gamma = jnp.ones((H,), jnp.float32) + 0.01 * jax.random.normal(kg, (H,), jnp.float32)
    beta = 0.01 * jax.random.normal(kb, (H,), jnp.float32)
    W = jax.random.normal(kw, (H, H), dtype=jnp.float32) * (1.0 / float(H) ** 0.5)
    bvec = 0.01 * jax.random.normal(kbi, (H,), dtype=jnp.float32)

    def linear_sublayer(t):
        return jnp.einsum("bsh,hd->bsd", t, W,
                          precision=jax.lax.Precision.HIGHEST) + bvec

    # plain-JAX reference for the eval path (dropout == identity)
    mean = jnp.mean(x, axis=-1, keepdims=True)
    var = jnp.mean((x - mean) ** 2, axis=-1, keepdims=True)
    normed_ref = (x - mean) * jax.lax.rsqrt(var + LN_EPS) * gamma + beta
    ref = x + linear_sublayer(normed_ref)

    # 1) fused fast path, eval mode (tolerance covers MXU f32 pass differences)
    out_fused = sublayer_connection_linear(
        x, W, bvec, gamma, beta, dropout_ratio=dropout_ratio, training=False)
    jax.block_until_ready(out_fused)
    assert out_fused.shape == (B, S, H)
    assert jnp.allclose(out_fused, ref, atol=2e-2, rtol=2e-2), "fused eval mismatch"

    # 2) generic path (opaque sublayer), eval mode
    out_gen = sublayer_connection(
        x, linear_sublayer, gamma, beta, dropout_ratio=dropout_ratio, training=False)
    jax.block_until_ready(out_gen)
    assert jnp.allclose(out_gen, ref, atol=1e-4, rtol=1e-4), "generic eval mismatch"

    # 3) fused path, training mode (dropout active, deterministic in-kernel PRNG)
    # TODO(synk): PyTorch's dropout RNG stream cannot be bit-matched; the mask
    # comes from a counter-based in-kernel PRNG instead.
    out_train = sublayer_connection_linear(
        x, W, bvec, gamma, beta, dropout_ratio=dropout_ratio,
        training=True, seed=1234)
    jax.block_until_ready(out_train)
    assert out_train.shape == (B, S, H)
    assert bool(jnp.all(jnp.isfinite(out_train)))
    # dropped positions reduce to out == x (sublayer contribution zeroed)
    dropped_frac = float(jnp.mean(jnp.isclose(out_train, x)))
    assert 0.01 < dropped_frac < 0.4, f"dropout fraction looks wrong: {dropped_frac}"

    # 4) generic path, training mode
    out_train_gen = sublayer_connection(
        x, linear_sublayer, gamma, beta, dropout_ratio=dropout_ratio,
        training=True, seed=1234)
    jax.block_until_ready(out_train_gen)
    assert bool(jnp.all(jnp.isfinite(out_train_gen)))

    print("KERNEL_OK")
</pallas_src>

<mosaic_0001>
module attributes {stable_mosaic.version = 11 : i64} {
  func.func @_fused_kernel(%arg0: i32, %arg1: memref<24x128xf32, #tpu.memory_space<vmem>>, %arg2: memref<1x128xf32, #tpu.memory_space<vmem>>, %arg3: memref<1x128xf32, #tpu.memory_space<vmem>>, %arg4: memref<128x128xf32, #tpu.memory_space<vmem>>, %arg5: memref<1x128xf32, #tpu.memory_space<vmem>>, %arg6: memref<1xi32, #tpu.memory_space<smem>>, %arg7: memref<24x128xf32, #tpu.memory_space<vmem>>) attributes {dimension_semantics = [#tpu.dimension_semantics<parallel>], iteration_bounds = array<i64: 1>, scalar_prefetch = 0 : i64, scratch_operands = 0 : i64, tpu.core_type = #tpu.core_type<tc>, window_params = [{transform_indices = @transform_0, window_bounds = array<i64: 24, 128>}, {pipeline_mode = #tpu.pipeline_mode<synchronous>, transform_indices = @transform_1, window_bounds = array<i64: 1, 128>}, {pipeline_mode = #tpu.pipeline_mode<synchronous>, transform_indices = @transform_2, window_bounds = array<i64: 1, 128>}, {pipeline_mode = #tpu.pipeline_mode<synchronous>, transform_indices = @transform_3, window_bounds = array<i64: 128, 128>}, {pipeline_mode = #tpu.pipeline_mode<synchronous>, transform_indices = @transform_4, window_bounds = array<i64: 1, 128>}, {transform_indices = @transform_5, window_bounds = array<i64: 1>}, {transform_indices = @transform_6, window_bounds = array<i64: 24, 128>}]} {
    %c0 = arith.constant 0 : index
    %c0_0 = arith.constant 0 : index
    %0 = vector.load %arg1[%c0, %c0_0] : memref<24x128xf32, #tpu.memory_space<vmem>>, vector<24x128xf32>
    %cst = arith.constant dense<0.000000e+00> : vector<24xf32>
    %1 = vector.multi_reduction <add>, %0, %cst [1] : vector<24x128xf32> to vector<24xf32>
    %2 = vector.shape_cast %1 : vector<24xf32> to vector<24x1xf32>
    %cst_1 = arith.constant 1.280000e+02 : f32
    %3 = vector.broadcast %cst_1 : f32 to vector<24x1xf32>
    %4 = arith.divf %2, %3 : vector<24x1xf32>
    %5 = vector.broadcast %4 : vector<24x1xf32> to vector<24x128xf32>
    %6 = arith.subf %0, %5 : vector<24x128xf32>
    %7 = arith.mulf %6, %6 : vector<24x128xf32>
    %cst_2 = arith.constant dense<0.000000e+00> : vector<24xf32>
    %8 = vector.multi_reduction <add>, %7, %cst_2 [1] : vector<24x128xf32> to vector<24xf32>
    %9 = vector.shape_cast %8 : vector<24xf32> to vector<24x1xf32>
    %cst_3 = arith.constant 1.280000e+02 : f32
    %10 = vector.broadcast %cst_3 : f32 to vector<24x1xf32>
    %11 = arith.divf %9, %10 : vector<24x1xf32>
    %cst_4 = arith.constant 9.99999974E-6 : f32
    %12 = vector.broadcast %cst_4 : f32 to vector<24x1xf32>
    %13 = arith.addf %11, %12 : vector<24x1xf32>
    %14 = math.rsqrt %13 : vector<24x1xf32>
    %15 = vector.broadcast %14 : vector<24x1xf32> to vector<24x128xf32>
    %16 = arith.mulf %6, %15 : vector<24x128xf32>
    %c0_5 = arith.constant 0 : index
    %c0_6 = arith.constant 0 : index
    %17 = vector.load %arg2[%c0_5, %c0_6] : memref<1x128xf32, #tpu.memory_space<vmem>>, vector<1x128xf32>
    %18 = vector.broadcast %17 : vector<1x128xf32> to vector<24x128xf32>
    %19 = arith.mulf %16, %18 : vector<24x128xf32>
    %c0_7 = arith.constant 0 : index
    %c0_8 = arith.constant 0 : index
    %20 = vector.load %arg3[%c0_7, %c0_8] : memref<1x128xf32, #tpu.memory_space<vmem>>, vector<1x128xf32>
    %21 = vector.broadcast %20 : vector<1x128xf32> to vector<24x128xf32>
    %22 = arith.addf %19, %21 : vector<24x128xf32>
    %c0_9 = arith.constant 0 : index
    %c0_10 = arith.constant 0 : index
    %23 = vector.load %arg4[%c0_9, %c0_10] : memref<128x128xf32, #tpu.memory_space<vmem>>, vector<128x128xf32>
    %cst_11 = arith.constant dense<0.000000e+00> : vector<24x128xf32>
    %24 = tpu.matmul %22, %23, %cst_11 {dimension_numbers = #tpu.dot_dimension_numbers<[1], [0], [0], [1], [0, 0, 1, 1], [], []>, precision = #tpu.contract_precision<fp32>} : vector<24x128xf32>, vector<128x128xf32>, vector<24x128xf32> -> vector<24x128xf32>
    %c0_12 = arith.constant 0 : index
    %c0_13 = arith.constant 0 : index
    %25 = vector.load %arg5[%c0_12, %c0_13] : memref<1x128xf32, #tpu.memory_space<vmem>>, vector<1x128xf32>
    %26 = vector.broadcast %25 : vector<1x128xf32> to vector<24x128xf32>
    %27 = arith.addf %24, %26 : vector<24x128xf32>
    %28 = arith.addf %0, %27 : vector<24x128xf32>
    %c0_14 = arith.constant 0 : index
    %c0_15 = arith.constant 0 : index
    %29 = vector.load %arg7[%c0_14, %c0_15] : memref<24x128xf32, #tpu.memory_space<vmem>>, vector<24x128xf32>
    tpu.vector_store %arg7[%c0_14, %c0_15], %28 {strides = array<i32>} : memref<24x128xf32, #tpu.memory_space<vmem>>, vector<24x128xf32>,
    return
  }
  func.func @transform_0(%arg0: i32) -> (i32, i32) {
    %c0_i32 = arith.constant 0 : i32
    %c0_i32_0 = arith.constant 0 : i32
    return %arg0, %c0_i32 : i32, i32
  }
  func.func @transform_1(%arg0: i32) -> (i32, i32) {
    %c0_i32 = arith.constant 0 : i32
    %c0_i32_0 = arith.constant 0 : i32
    %c0_i32_1 = arith.constant 0 : i32
    return %c0_i32, %c0_i32_0 : i32, i32
  }
  func.func @transform_2(%arg0: i32) -> (i32, i32) {
    %c0_i32 = arith.constant 0 : i32
    %c0_i32_0 = arith.constant 0 : i32
    %c0_i32_1 = arith.constant 0 : i32
    return %c0_i32, %c0_i32_0 : i32, i32
  }
  func.func @transform_3(%arg0: i32) -> (i32, i32) {
    %c0_i32 = arith.constant 0 : i32
    %c0_i32_0 = arith.constant 0 : i32
    %c0_i32_1 = arith.constant 0 : i32
    return %c0_i32, %c0_i32_0 : i32, i32
  }
  func.func @transform_4(%arg0: i32) -> (i32, i32) {
    %c0_i32 = arith.constant 0 : i32
    %c0_i32_0 = arith.constant 0 : i32
    %c0_i32_1 = arith.constant 0 : i32
    return %c0_i32, %c0_i32_0 : i32, i32
  }
  func.func @transform_5(%arg0: i32) -> i32 {
    %c0_i32 = arith.constant 0 : i32
    %c0_i32_0 = arith.constant 0 : i32
    return %c0_i32 : i32
  }
  func.func @transform_6(%arg0: i32) -> (i32, i32) {
    %c0_i32 = arith.constant 0 : i32
    %c0_i32_0 = arith.constant 0 : i32
    return %arg0, %c0_i32 : i32, i32
  }
}

</mosaic_0001>

<bundles_post_ra>
// kernel: tpu_custom_call.1
= control target key start
LH: loop header
LB: loop body
LE: loop exit
PB: predicated region body
PF: predicated region fallthrough
CT: control target
= control target key end

     0   :  { %12 = vsyncpa [#allocation4], 0  ;;  %s1842_s0 = inlined_call_operand.hbm [shape: f32[24,128], index: 0, kind: input, shape index: {}]   ;;  %s1843_s1 = inlined_call_operand.vmem [shape: f32[1,128], index: 1, kind: input, shape index: {}]   ;;  %s1844_s2 = inlined_call_operand.vmem [shape: f32[1,128], index: 2, kind: input, shape index: {}]   ;;  %s1845_s3 = inlined_call_operand.hbm [shape: f32[128,128], index: 3, kind: input, shape index: {}]   ;;  %s1846_s4 = inlined_call_operand.vmem [shape: f32[1,128], index: 4, kind: input, shape index: {}]   ;;  %s1847_s5 = inlined_call_operand.<no memory space> [shape: s32[1], index: 5, kind: input, shape index: {}]   ;;  %s1848_s6 = inlined_call_operand.hbm [shape: f32[24,128], index: 6, kind: output, shape index: {}]  }
   0x1   :  { %13 = vsyncpa [#allocation7], 0 }
   0x2   :  { %14 = vsyncpa [#allocation5], 0  ;;  %s1326_s21 = smov [#allocation3]  }
   0x3   :  { %s20_s22 = sshll.u32 %s1326_s21, 4  ;;  %s21_s22 = int_to_ptr.vmem [resolvable:$true] %s20_s22 }
   0x4   :  { %s1268_s23 = scalar_lea.vmem %s21_s22, 384  ;;  %p1273_p1 = scmp.lt.s32.totalorder %s21_s22, %s21_s22 }
   0x5   :  { %p1269_p0 = scmp.ne.s32.totalorder %s21_s22, %s1268_s23  ;;  %p1274_p2 = scmp.lt.s32.totalorder %s1268_s23, %s1268_s23 }
   0x7   :  { %p1275_p3 = por %p1274_p2, %p1273_p1 }
   0x9   :  { %p1276_p4 = pnand %p1275_p3, %p1269_p0 }
   0xb   :  { %1279 = shalt.err (!%p1276_p4)
}
   0xc   :  { %s1327_s24 = smov 128   ;;  %s1328_s25 = smov 8  }
   0xd   :  { %26 = dma.hbm_to_vmem [thread:$0]  %s1842_s0, 384, %s21_s22, [#allocation4], %s1327_s24, %s1327_s24, %s1328_s25  }
   0xe   :  { %s1329_s27 = smov [#allocation6]  }
   0xf   :  { %s36_s28 = sshll.u32 %s1329_s27, 4  ;;  %s37_s28 = int_to_ptr.vmem [resolvable:$true] %s36_s28 }
  0x10   :  { %s1288_s29 = scalar_lea.vmem %s37_s28, 2048  ;;  %p1293_p6 = scmp.lt.s32.totalorder %s37_s28, %s37_s28 }
  0x11   :  { %p1289_p5 = scmp.ne.s32.totalorder %s37_s28, %s1288_s29  ;;  %p1294_p7 = scmp.lt.s32.totalorder %s1288_s29, %s1288_s29 }
  0x13   :  { %p1295_p8 = por %p1294_p7, %p1293_p6 }
  0x15   :  { %p1296_p9 = pnand %p1295_p8, %p1289_p5 }
  0x17   :  { %1299 = shalt.err (!%p1296_p9)
}
  0x18   :  { %42 = dma.hbm_to_vmem [thread:$0]  %s1845_s3, 2048, %s37_s28, [#allocation7], %s1327_s24, %s1327_s24, %s1328_s25  }
  0x19   :  { %1320 = dma.done.wait [#allocation4], 384  }
  0x1a   :  { %1321 = vsyncadd [#allocation4], 4294966912 }
  0x1b   :  { %1322 = dma.done.wait [#allocation7], 2048  }
  0x1c   :  { %1323 = vsyncadd [#allocation7], 4294965248  ;;  %v1380_v0 = vld [vmem:[#allocation3] sm:$0xff]  ;;  %v1382_v1 = vld [vmem:[#allocation3 + $0x10] sm:$0xff]  ;;  %v1330_v6 = vmov 0.0   ;;  %vm1331_vm0 = vmmov 0  }
  0x1d   :  { %56 = vadd.xlane.f32.xlu0 %v1380_v0  ;;  %60 = vadd.xlane.f32.xlu1 %v1382_v1  ;;  %v1386_v2 = vld [vmem:[#allocation3 + $0x8] sm:$0xff]  ;;  %v125_v3 = vld [vmem:[#allocation6 + $0x78] sm:$0xff]  ;;  %v123_v5 = vld [vmem:[#allocation6 + $0x68] sm:$0xff] }
  0x1e   :  { %v124_v4 = vld [vmem:[#allocation6 + $0x70] sm:$0xff]  ;;  %1042 = vmatprep.subr.mxu1 %v1330_v6  ;;  %v1390_v7 = vand.u32 4294901760, %v125_v3  ;;  %v1394_v9 = vand.u32 4294901760, %v123_v5  ;;  %1001 = vmatprep.subr.mxu0 %v1330_v6  ;;  %v122_v31 = vld [vmem:[#allocation6 + $0x60] sm:$0xff]  ;;  %v121_v35 = vld [vmem:[#allocation6 + $0x58] sm:$0xff] }
  0x1f   :  { %v1392_v8 = vand.u32 4294901760, %v124_v4  ;;  %v1440_v34 = vand.u32 4294901760, %v122_v31  ;;  %v1447_v38 = vand.u32 4294901760, %v121_v35  ;;  %v120_v41 = vld [vmem:[#allocation6 + $0x50] sm:$0xff]  ;;  %v119_v45 = vld [vmem:[#allocation6 + $0x48] sm:$0xff]  ;;  %v118_v50 = vld [vmem:[#allocation6 + $0x40] sm:$0xff]  ;;  %1074 = vmatprep.mubr.msk.f32.mxu1 %vm1331_vm0, %v1330_v6  ;;  %1033 = vmatprep.mubr.msk.f32.mxu0 %vm1331_vm0, %v1330_v6 }
  0x20   :  { %v1398_v10 = vsub.f32 %v125_v3, %v1390_v7  ;;  %v1404_v12 = vsub.f32 %v123_v5, %v1394_v9  ;;  %1002 = vmatpush3.msra.mxu0 %v1390_v7  ;;  %v1455_v42 = vand.u32 4294901760, %v120_v41  ;;  %v1466_v47 = vand.u32 4294901760, %v119_v45  ;;  %v117_v55 = vld [vmem:[#allocation6 + $0x38] sm:$0xff]  ;;  %v116_v60 = vld [vmem:[#allocation6 + $0x30] sm:$0xff]  ;;  %v115_v5 = vld [vmem:[#allocation6 + $0x28] sm:$0xff] }
  0x21   :  { %58 = vadd.xlane.f32.xlu0 %v1386_v2  ;;  %v1401_v11 = vsub.f32 %v124_v4, %v1392_v8  ;;  %1003 = vmatprep.subr.mxu0 %v1330_v6  ;;  %v1445_v37 = vsub.f32 %v122_v31, %v1440_v34  ;;  %v1453_v40 = vsub.f32 %v121_v35, %v1447_v38  ;;  %v1477_v53 = vand.u32 4294901760, %v118_v50 }
  0x22   :  { %v247_v13 = vand.u32 4294901760, %v1398_v10  ;;  %v261_v15 = vand.u32 4294901760, %v1404_v12  ;;  %1004 = vmatpush3.msra.mxu0 %v1392_v8  ;;  %v1464_v46 = vsub.f32 %v120_v41, %v1455_v42  ;;  %v1475_v52 = vsub.f32 %v119_v45, %v1466_v47  ;;  %v111_v41 = vld [vmem:[#allocation6 + $0x8] sm:$0xff] }
  0x23   :  { %v254_v14 = vand.u32 4294901760, %v1401_v11  ;;  %1005 = vmatprep.subr.mxu0 %v1330_v6  ;;  %v268_v39 = vand.u32 4294901760, %v1445_v37  ;;  %v275_v44 = vand.u32 4294901760, %v1453_v40  ;;  %v1487_v58 = vsub.f32 %v118_v50, %v1477_v53 }
  0x24   :  { %v248_v16 = vsub.f32 %v1398_v10, %v247_v13  ;;  %v262_v18 = vsub.f32 %v1404_v12, %v261_v15  ;;  %1006 = vmatpush3.msra.mxu0 %v1394_v9  ;;  %v282_v51 = vand.u32 4294901760, %v1464_v46  ;;  %v289_v57 = vand.u32 4294901760, %v1475_v52 }
  0x25   :  { %v255_v17 = vsub.f32 %v1401_v11, %v254_v14  ;;  %1007 = vmatprep.subr.mxu0 %v1330_v6  ;;  %v269_v43 = vsub.f32 %v1445_v37, %v268_v39  ;;  %v276_v49 = vsub.f32 %v1453_v40, %v275_v44  ;;  %v1489_v59 = vand.u32 4294901760, %v117_v55 }
  0x26   :  { %v249_v19 = vand.u32 4294901760, %v248_v16  ;;  %v263_v21 = vand.u32 4294901760, %v262_v18  ;;  %1008 = vmatpush3.msra.mxu0 %v1440_v34  ;;  %v283_v56 = vsub.f32 %v1464_v46, %v282_v51  ;;  %v290_v62 = vsub.f32 %v1475_v52, %v289_v57 }
  0x27   :  { %v256_v20 = vand.u32 4294901760, %v255_v17  ;;  %1009 = vmatprep.subr.mxu0 %v1330_v6  ;;  %v270_v48 = vand.u32 4294901760, %v269_v43  ;;  %v277_v54 = vand.u32 4294901760, %v276_v49  ;;  %v296_v63 = vand.u32 4294901760, %v1487_v58  ;;  %v110_v43 = vld [vmem:[#allocation6] sm:$0xff] }
  0x28   :  { %1043 = vmatpush3.msra.mxu1 %v249_v19  ;;  %1010 = vmatpush3.msra.mxu0 %v1447_v38  ;;  %v284_v61 = vand.u32 4294901760, %v283_v56  ;;  %v1499_v3 = vsub.f32 %v117_v55, %v1489_v59  ;;  %v1502_v4 = vand.u32 4294901760, %v116_v60  ;;  %v291_v16 = vand.u32 4294901760, %v290_v62 }
  0x29   :  { %1044 = vmatprep.subr.mxu1 %v1330_v6  ;;  %1011 = vmatprep.subr.mxu0 %v1330_v6  ;;  %v297_v17 = vsub.f32 %v1487_v58, %v296_v63  ;;  %v1509_v19 = vand.u32 4294901760, %v115_v5  ;;  %v1541_v49 = vand.u32 4294901760, %v111_v41  ;;  %v1544_v50 = vand.u32 4294901760, %v110_v43 }
  0x2a   :  { %1045 = vmatpush3.msra.mxu1 %v256_v20  ;;  %1012 = vmatpush3.msra.mxu0 %v1455_v42  ;;  %v303_v18 = vand.u32 4294901760, %v1499_v3  ;;  %v1513_v20 = vsub.f32 %v116_v60, %v1502_v4 }
  0x2b   :  { %1046 = vmatprep.subr.mxu1 %v1330_v6  ;;  %1013 = vmatprep.subr.mxu0 %v1330_v6  ;;  %v1559_v62 = vsub.f32 %v111_v41, %v1541_v49 }
  0x2c   :  { %1047 = vmatpush3.msra.mxu1 %v263_v21  ;;  %1014 = vmatpush3.msra.mxu0 %v1466_v47  ;;  %v114_v21 = vld [vmem:[#allocation6 + $0x20] sm:$0xff] }
  0x2d   :  { %1048 = vmatprep.subr.mxu1 %v1330_v6  ;;  %1015 = vmatprep.subr.mxu0 %v1330_v6 }
  0x2e   :  { %1049 = vmatpush3.msra.mxu1 %v270_v48  ;;  %1016 = vmatpush3.msra.mxu0 %v1477_v53 }
  0x2f   :  { %1050 = vmatprep.subr.mxu1 %v1330_v6  ;;  %1017 = vmatprep.subr.mxu0 %v1330_v6 }
  0x30   :  { %1051 = vmatpush3.msra.mxu1 %v277_v54  ;;  %1018 = vmatpush3.msra.mxu0 %v1489_v59 }
  0x31   :  { %1052 = vmatprep.subr.mxu1 %v1330_v6  ;;  %1019 = vmatprep.subr.mxu0 %v1330_v6 }
  0x32   :  { %1053 = vmatpush3.msra.mxu1 %v284_v61  ;;  %1020 = vmatpush3.msra.mxu0 %v1502_v4 }
  0x33   :  { %1054 = vmatprep.subr.mxu1 %v1330_v6  ;;  %1021 = vmatprep.subr.mxu0 %v1330_v6 }
  0x34   :  { %1055 = vmatpush3.msra.mxu1 %v291_v16  ;;  %1022 = vmatpush3.msra.mxu0 %v1509_v19 }
  0x35   :  { %1056 = vmatprep.subr.mxu1 %v1330_v6  ;;  %1023 = vmatprep.subr.mxu0 %v1330_v6 }
  0xa6   :  { %v57_v22 = vpop.xlane.xlu0 %56  ;;  %v61_v23 = vpop.xlane.xlu1 %60 }
  0xa7   :  { %v63_v24 = vmul.f32 0.0078125, %v57_v22  ;;  %v65_v25 = vmul.f32 0.0078125, %v61_v23  ;;  %v298_v22 = vand.u32 4294901760, %v297_v17  ;;  %v304_v23 = vsub.f32 %v1499_v3, %v303_v18 }
  0xa9   :  { %v1428_v26 = vsub.f32 %v1380_v0, %v63_v24  ;;  %v1431_v27 = vsub.f32 %v1382_v1, %v65_v25  ;;  %v1520_v24 = vsub.f32 %v115_v5, %v1509_v19  ;;  %v1522_v25 = vand.u32 4294901760, %v114_v21  ;;  %1057 = vmatpush3.msra.mxu1 %v298_v22 }
  0xaa   :  { %v59_v28 = vpop.xlane.xlu0 %58  ;;  %1058 = vmatprep.subr.mxu1 %v1330_v6  ;;  %v1562_v5 = vsub.f32 %v110_v43, %v1544_v50 }
  0xab   :  { %v64_v29 = vmul.f32 0.0078125, %v59_v28  ;;  %v69_v30 = vmul.f32 %v1428_v26, %v1428_v26  ;;  %v71_v33 = vmul.f32 %v1431_v27, %v1431_v27  ;;  %v310_v28 = vand.u32 4294901760, %v1513_v20  ;;  %1024 = vmatpush3.msra.mxu0 %v1522_v25 }
  0xac   :  { %v317_v31 = vand.u32 4294901760, %v1520_v24  ;;  %1025 = vmatprep.subr.mxu0 %v1330_v6 }
  0xad   :  { %v1436_v32 = vsub.f32 %v1386_v2, %v64_v29  ;;  %72 = vadd.xlane.f32.xlu1 %v69_v30  ;;  %v113_v29 = vld [vmem:[#allocation6 + $0x18] sm:$0xff]  ;;  %v305_v30 = vand.u32 4294901760, %v304_v23  ;;  %v311_v45 = vsub.f32 %v1513_v20, %v310_v28  ;;  %v1850_v23 = vand.u32 4294901760, %v1559_v62 }
  0xae   :  { %v1532_v35 = vand.u32 4294901760, %v113_v29  ;;  %v318_v54 = vsub.f32 %v1520_v24, %v317_v31 }
  0xaf   :  { %v70_v36 = vmul.f32 %v1436_v32, %v1436_v32  ;;  %1059 = vmatpush3.msra.mxu1 %v305_v30  ;;  %v312_v60 = vand.u32 4294901760, %v311_v45  ;;  %v346_v43 = vsub.f32 %v1559_v62, %v1850_v23 }
  0xb0   :  { %v1551_v56 = vsub.f32 %v113_v29, %v1532_v35  ;;  %1060 = vmatprep.subr.mxu1 %v1330_v6  ;;  %v319_v16 = vand.u32 4294901760, %v318_v54  ;;  %1026 = vmatpush3.msra.mxu0 %v1532_v35  ;;  %v1849_v29 = vand.u32 4294901760, %v1562_v5 }
  0xb1   :  { %76 = vadd.xlane.f32.xlu1 %v71_v33  ;;  %74 = vadd.xlane.f32.xlu0 %v70_v36  ;;  %v1530_v33 = vsub.f32 %v114_v21, %v1522_v25  ;;  %v112_v36 = vld [vmem:[#allocation6 + $0x10] sm:$0xff] }
  0xb2   :  { %v1539_v48 = vand.u32 4294901760, %v112_v36  ;;  %v1852_v21 = vand.u32 4294901760, %v1551_v56  ;;  %1061 = vmatpush3.msra.mxu1 %v312_v60  ;;  %1027 = vmatprep.subr.mxu0 %v1330_v6  ;;  %v353_v60 = vsub.f32 %v1562_v5, %v1849_v29 }
  0xb3   :  { %v324_v55 = vand.u32 4294901760, %v1530_v33  ;;  %1062 = vmatprep.subr.mxu1 %v1330_v6 }
  0xb4   :  { %v1556_v61 = vsub.f32 %v112_v36, %v1539_v48  ;;  %v332_v36 = vsub.f32 %v1551_v56, %v1852_v21  ;;  %1028 = vmatpush3.msra.mxu0 %v1539_v48  ;;  %1063 = vmatpush3.msra.mxu1 %v319_v16  ;;  %v347_v16 = vand.u32 4294901760, %v346_v43 }
  0xb5   :  { %v325_v17 = vsub.f32 %v1530_v33, %v324_v55  ;;  %1029 = vmatprep.subr.mxu0 %v1330_v6  ;;  %1064 = vmatprep.subr.mxu1 %v1330_v6 }
  0xb6   :  { %v1851_v22 = vand.u32 4294901760, %v1556_v61  ;;  %v333_v45 = vand.u32 4294901760, %v332_v36  ;;  %1030 = vmatpush3.msra.mxu0 %v1541_v49 }
  0xb7   :  { %v326_v30 = vand.u32 4294901760, %v325_v17  ;;  %1031 = vmatprep.subr.mxu0 %v1330_v6  ;;  %v354_v17 = vand.u32 4294901760, %v353_v60  ;;  %v884_v60 = vld [vmem:[%s1843_s1] ss:$0 sm:$0xff] }
  0xb8   :  { %v339_v41 = vsub.f32 %v1556_v61, %v1851_v22  ;;  %1032 = vmatpush3.msra.mxu0 %v1544_v50 }
  0xb9   :  { %1065 = vmatpush3.msra.mxu1 %v326_v30  ;;  %1083 = vmatprep.subr.mxu0 %v1330_v6 }
  0xba   :  { %v340_v54 = vand.u32 4294901760, %v339_v41  ;;  %1066 = vmatprep.subr.mxu1 %v1330_v6 }
  0xbb   :  { %1067 = vmatpush3.msra.mxu1 %v333_v45 }
  0xbc   :  { %1068 = vmatprep.subr.mxu1 %v1330_v6 }
  0xbd   :  { %1069 = vmatpush3.msra.mxu1 %v340_v54 }
  0xbe   :  { %1070 = vmatprep.subr.mxu1 %v1330_v6 }
  0xbf   :  { %1071 = vmatpush3.msra.mxu1 %v347_v16 }
  0xc0   :  { %1072 = vmatprep.subr.mxu1 %v1330_v6 }
  0xc1   :  { %1073 = vmatpush3.msra.mxu1 %v354_v17  ;;  %v885_v17 = vld [vmem:[%s1844_s2] ss:$0 sm:$0xff] }
  0xc2   :  { %1124 = vmatprep.subr.mxu1 %v1330_v6 }
 0x136   :  { %v73_v30 = vpop.xlane.xlu1 %72 }
 0x137   :  { %v78_v36 = vmul.f32 0.0078125, %v73_v30 }
 0x139   :  { %v81_v41 = vadd.f32 1e-05, %v78_v36 }
 0x13a   :  { %v77_v29 = vpop.xlane.xlu1 %76  ;;  %v75_v45 = vpop.xlane.xlu0 %74 }
 0x13b   :  { %1254 = vrsqrt.f32 %v81_v41  ;;  %v80_v43 = vmul.f32 0.0078125, %v77_v29  ;;  %v79_v23 = vmul.f32 0.0078125, %v75_v45 }
 0x13d   :  { %v83_v22 = vadd.f32 1e-05, %v80_v43  ;;  %v82_v21 = vadd.f32 1e-05, %v79_v23 }
 0x13f   :  { %1256 = vrsqrt.f32 %v83_v22 }
 0x140   :  { %1258 = vrsqrt.f32 %v82_v21 }
 0x148   :  { %v1255_v54 = vpop.eup %1254 }
 0x149   :  { %v87_v16 = vmul.f32 %v1255_v54, %v1428_v26 }
 0x14b   :  { %v97_v30 = vmul.f32 %v884_v60, %v87_v16 }
 0x14c   :  { %v1257_v36 = vpop.eup %1256 }
 0x14d   :  { %v1259_v41 = vpop.eup %1258  ;;  %v107_v29 = vadd.f32 %v885_v17, %v97_v30  ;;  %v89_v45 = vmul.f32 %v1257_v36, %v1431_v27 }
 0x14e   :  { %v88_v22 = vmul.f32 %v1259_v41, %v1436_v32 }
 0x14f   :  { %v1611_v21 = vand.u32 4294901760, %v107_v29  ;;  %v99_v23 = vmul.f32 %v884_v60, %v89_v45 }
 0x150   :  { %v98_v43 = vmul.f32 %v884_v60, %v88_v22 }
 0x151   :  { %1075 = vmatmul.mubr.f32.vlgmr.msra.gmra.mxu1 %v1611_v21  ;;  %v1615_v26 = vsub.f32 %v107_v29, %v1611_v21  ;;  %v109_v54 = vadd.f32 %v885_v17, %v99_v23 }
 0x152   :  { %1125 = vmatpush3.msra.mxu1 %v1390_v7  ;;  %1077 = vmatprep.mubr.msk.f32.mxu1 %vm1331_vm0, %v1330_v6  ;;  %v108_v16 = vadd.f32 %v885_v17, %v98_v43 }
 0x153   :  { %1126 = vmatprep.subr.mxu1 %v1330_v6  ;;  %v216_v27 = vand.u32 4294901760, %v1615_v26  ;;  %v1622_v32 = vand.u32 4294901760, %v109_v54 }
 0x154   :  { %1127 = vmatpush3.msra.mxu1 %v1392_v8  ;;  %v1625_v60 = vand.u32 4294901760, %v108_v16 }
 0x155   :  { %1128 = vmatprep.subr.mxu1 %v1330_v6  ;;  %v217_v30 = vsub.f32 %v1615_v26, %v216_v27  ;;  %v1636_v36 = vsub.f32 %v109_v54, %v1622_v32 }
 0x156   :  { %1078 = vmatmul.mubr.f32.gmra.mxu1 %v1625_v60  ;;  %v1633_v17 = vsub.f32 %v108_v16, %v1625_v60 }
 0x157   :  { %1129 = vmatpush3.msra.mxu1 %v1394_v9  ;;  %1080 = vmatprep.mubr.msk.f32.mxu1 %vm1331_vm0, %v1330_v6  ;;  %v218_v41 = vand.u32 4294901760, %v217_v30  ;;  %v236_v22 = vand.u32 4294901760, %v1636_v36 }
 0x158   :  { %1130 = vmatprep.subr.mxu1 %v1330_v6  ;;  %v226_v29 = vand.u32 4294901760, %v1633_v17 }
 0x159   :  { %1131 = vmatpush3.msra.mxu1 %v1440_v34  ;;  %1034 = vmatmul.mubr.f32.vlgmr.msra.gmra.mxu0 %v218_v41  ;;  %v237_v43 = vsub.f32 %v1636_v36, %v236_v22 }
 0x15a   :  { %1132 = vmatprep.subr.mxu1 %v1330_v6  ;;  %1081 = vmatmul.mubr.f32.gmra.mxu1 %v1622_v32  ;;  %v227_v45 = vsub.f32 %v1633_v17, %v226_v29 }
 0x15b   :  { %1084 = vmatpush3.msra.mxu0 %v1398_v10  ;;  %1133 = vmatpush3.msra.mxu1 %v1447_v38  ;;  %v238_v54 = vand.u32 4294901760, %v237_v43  ;;  %v1856_v10 = vand.u32 4294901760, %v1562_v5 }
 0x15c   :  { %1085 = vmatprep.subr.mxu0 %v1330_v6  ;;  %1134 = vmatprep.subr.mxu1 %v1330_v6  ;;  %v228_v23 = vand.u32 4294901760, %v227_v45 }
 0x15d   :  { %1086 = vmatpush3.msra.mxu0 %v1401_v11  ;;  %1135 = vmatpush3.msra.mxu1 %v1455_v42 }
 0x15e   :  { %1036 = vmatprep.mubr.msk.f32.mxu0 %vm1331_vm0, %v1330_v6  ;;  %1087 = vmatprep.subr.mxu0 %v1330_v6 }
 0x15f   :  { %1136 = vmatprep.subr.mxu1 %v1330_v6  ;;  %1037 = vmatmul.mubr.f32.gmra.mxu0 %v228_v23 }
 0x160   :  { %1088 = vmatpush3.msra.mxu0 %v1404_v12  ;;  %1137 = vmatpush3.msra.mxu1 %v1466_v47 }
 0x161   :  { %1089 = vmatprep.subr.mxu0 %v1330_v6  ;;  %1138 = vmatprep.subr.mxu1 %v1330_v6 }
 0x162   :  { %1090 = vmatpush3.msra.mxu0 %v1445_v37  ;;  %1139 = vmatpush3.msra.mxu1 %v1477_v53 }
 0x163   :  { %1039 = vmatprep.mubr.msk.f32.mxu0 %vm1331_vm0, %v1330_v6  ;;  %1091 = vmatprep.subr.mxu0 %v1330_v6 }
 0x164   :  { %1140 = vmatprep.subr.mxu1 %v1330_v6  ;;  %1040 = vmatmul.mubr.f32.gmra.mxu0 %v238_v54 }
 0x165   :  { %1092 = vmatpush3.msra.mxu0 %v1453_v40  ;;  %1141 = vmatpush3.msra.mxu1 %v1489_v59 }
 0x166   :  { %1093 = vmatprep.subr.mxu0 %v1330_v6  ;;  %1142 = vmatprep.subr.mxu1 %v1330_v6 }
 0x167   :  { %1094 = vmatpush3.msra.mxu0 %v1464_v46  ;;  %1143 = vmatpush3.msra.mxu1 %v1502_v4 }
 0x168   :  { %1095 = vmatprep.subr.mxu0 %v1330_v6  ;;  %1144 = vmatprep.subr.mxu1 %v1330_v6 }
 0x169   :  { %1096 = vmatpush3.msra.mxu0 %v1475_v52  ;;  %1145 = vmatpush3.msra.mxu1 %v1509_v19 }
 0x16a   :  { %1097 = vmatprep.subr.mxu0 %v1330_v6  ;;  %1146 = vmatprep.subr.mxu1 %v1330_v6 }
 0x16b   :  { %1098 = vmatpush3.msra.mxu0 %v1487_v58  ;;  %1147 = vmatpush3.msra.mxu1 %v1522_v25 }
 0x16c   :  { %1099 = vmatprep.subr.mxu0 %v1330_v6  ;;  %1148 = vmatprep.subr.mxu1 %v1330_v6 }
 0x16d   :  { %1100 = vmatpush3.msra.mxu0 %v1499_v3  ;;  %1149 = vmatpush3.msra.mxu1 %v1532_v35 }
 0x16e   :  { %1101 = vmatprep.subr.mxu0 %v1330_v6  ;;  %1150 = vmatprep.subr.mxu1 %v1330_v6 }
 0x16f   :  { %1102 = vmatpush3.msra.mxu0 %v1513_v20  ;;  %1151 = vmatpush3.msra.mxu1 %v1539_v48 }
 0x170   :  { %1103 = vmatprep.subr.mxu0 %v1330_v6  ;;  %1152 = vmatprep.subr.mxu1 %v1330_v6 }
 0x171   :  { %1104 = vmatpush3.msra.mxu0 %v1520_v24  ;;  %1153 = vmatpush3.msra.mxu1 %v1541_v49 }
 0x172   :  { %1105 = vmatprep.subr.mxu0 %v1330_v6  ;;  %1154 = vmatprep.subr.mxu1 %v1330_v6 }
 0x173   :  { %1106 = vmatpush3.msra.mxu0 %v1530_v33  ;;  %1155 = vmatpush3.msra.mxu1 %v1544_v50 }
 0x174   :  { %1156 = vmatprep.mubr.msk.f32.mxu1 %vm1331_vm0, %v1330_v6  ;;  %1107 = vmatprep.subr.mxu0 %v1330_v6 }
 0x175   :  { %1157 = vmatmul.mubr.f32.vlgmr.msra.gmra.mxu1 %v216_v27  ;;  %1206 = vmatprep.subr.mxu1 %v1330_v6 }
 0x176   :  { %1108 = vmatpush3.msra.mxu0 %v1551_v56  ;;  %1207 = vmatpush3.msra.mxu1 %v1390_v7  ;;  %v1853_v7 = vand.u32 4294901760, %v1551_v56 }
 0x177   :  { %1109 = vmatprep.subr.mxu0 %v1330_v6  ;;  %1208 = vmatprep.subr.mxu1 %v1330_v6 }
 0x178   :  { %1110 = vmatpush3.msra.mxu0 %v1556_v61  ;;  %1159 = vmatprep.mubr.msk.f32.mxu1 %vm1331_vm0, %v1330_v6 }
 0x179   :  { %1209 = vmatpush3.msra.mxu1 %v1392_v8  ;;  %1111 = vmatprep.subr.mxu0 %v1330_v6  ;;  %v1854_v8 = vand.u32 4294901760, %v1556_v61 }
 0x17a   :  { %1160 = vmatmul.mubr.f32.gmra.mxu1 %v226_v29  ;;  %1210 = vmatprep.subr.mxu1 %v1330_v6 }
 0x17b   :  { %1112 = vmatpush3.msra.mxu0 %v1559_v62  ;;  %1211 = vmatpush3.msra.mxu1 %v1394_v9  ;;  %v1855_v9 = vand.u32 4294901760, %v1559_v62 }
 0x17c   :  { %1113 = vmatprep.subr.mxu0 %v1330_v6  ;;  %1212 = vmatprep.subr.mxu1 %v1330_v6 }
 0x17d   :  { %1114 = vmatpush3.msra.mxu0 %v1562_v5  ;;  %1115 = vmatprep.mubr.msk.f32.mxu0 %vm1331_vm0, %v1330_v6 }
 0x17e   :  { %1162 = vmatprep.mubr.msk.f32.mxu1 %vm1331_vm0, %v1330_v6  ;;  %1213 = vmatpush3.msra.mxu1 %v1440_v34 }
 0x17f   :  { %1116 = vmatmul.mubr.f32.vlgmr.msra.gmra.mxu0 %v1615_v26  ;;  %1163 = vmatmul.mubr.f32.gmra.mxu1 %v236_v22 }
 0x180   :  { %1165 = vmatprep.subr.mxu0 %v1330_v6  ;;  %1214 = vmatprep.subr.mxu1 %v1330_v6 }
 0x181   :  { %1166 = vmatpush3.msra.mxu0 %v247_v13  ;;  %1215 = vmatpush3.msra.mxu1 %v1447_v38 }
 0x182   :  { %1167 = vmatprep.subr.mxu0 %v1330_v6  ;;  %1216 = vmatprep.subr.mxu1 %v1330_v6 }
 0x183   :  { %1118 = vmatprep.mubr.msk.f32.mxu0 %vm1331_vm0, %v1330_v6  ;;  %1168 = vmatpush3.msra.mxu0 %v254_v14  ;;  %v886_v14 = vld [vmem:[%s1846_s4] ss:$0 sm:$0xff]  ;;  %s1332_s4 = smov [#allocation8]  }
 0x184   :  { %1217 = vmatpush3.msra.mxu1 %v1455_v42  ;;  %1119 = vmatmul.mubr.f32.gmra.mxu0 %v1633_v17  ;;  %s871_s10 = sshll.u32 %s1332_s4, 4  ;;  %s872_s10 = int_to_ptr.vmem [resolvable:$true] %s871_s10 }
 0x185   :  { %1169 = vmatprep.subr.mxu0 %v1330_v6  ;;  %1218 = vmatprep.subr.mxu1 %v1330_v6  ;;  %s1300_s11 = scalar_lea.vmem %s872_s10, 384  ;;  %p1305_p11 = scmp.lt.s32.totalorder %s872_s10, %s872_s10 }
 0x186   :  { %1170 = vmatpush3.msra.mxu0 %v261_v15  ;;  %1219 = vmatpush3.msra.mxu1 %v1466_v47  ;;  %p1301_p10 = scmp.ne.s32.totalorder %s872_s10, %s1300_s11  ;;  %p1306_p12 = scmp.lt.s32.totalorder %s1300_s11, %s1300_s11 }
 0x187   :  { %1171 = vmatprep.subr.mxu0 %v1330_v6  ;;  %1220 = vmatprep.subr.mxu1 %v1330_v6 }
 0x188   :  { %1121 = vmatprep.mubr.msk.f32.mxu0 %vm1331_vm0, %v1330_v6  ;;  %1172 = vmatpush3.msra.mxu0 %v268_v39  ;;  %p1307_p13 = por %p1306_p12, %p1305_p11 }
 0x189   :  { %1221 = vmatpush3.msra.mxu1 %v1477_v53  ;;  %1122 = vmatmul.mubr.f32.gmra.mxu0 %v1636_v36 }
 0x18a   :  { %1173 = vmatprep.subr.mxu0 %v1330_v6  ;;  %1222 = vmatprep.subr.mxu1 %v1330_v6  ;;  %p1308_p0 = pnand %p1307_p13, %p1301_p10 }
 0x18b   :  { %1174 = vmatpush3.msra.mxu0 %v275_v44  ;;  %1223 = vmatpush3.msra.mxu1 %v1489_v59 }
 0x18c   :  { %1175 = vmatprep.subr.mxu0 %v1330_v6  ;;  %1224 = vmatprep.subr.mxu1 %v1330_v6 }
 0x18d   :  { %1176 = vmatpush3.msra.mxu0 %v282_v51  ;;  %1225 = vmatpush3.msra.mxu1 %v1502_v4 }
 0x18e   :  { %1177 = vmatprep.subr.mxu0 %v1330_v6  ;;  %1226 = vmatprep.subr.mxu1 %v1330_v6 }
 0x18f   :  { %1178 = vmatpush3.msra.mxu0 %v289_v57  ;;  %1227 = vmatpush3.msra.mxu1 %v1509_v19 }
 0x190   :  { %1179 = vmatprep.subr.mxu0 %v1330_v6  ;;  %1228 = vmatprep.subr.mxu1 %v1330_v6 }
 0x191   :  { %1180 = vmatpush3.msra.mxu0 %v296_v63  ;;  %1229 = vmatpush3.msra.mxu1 %v1522_v25 }
 0x192   :  { %1181 = vmatprep.subr.mxu0 %v1330_v6  ;;  %1230 = vmatprep.subr.mxu1 %v1330_v6 }
 0x193   :  { %1182 = vmatpush3.msra.mxu0 %v303_v18  ;;  %1231 = vmatpush3.msra.mxu1 %v1532_v35 }
 0x194   :  { %1183 = vmatprep.subr.mxu0 %v1330_v6  ;;  %1232 = vmatprep.subr.mxu1 %v1330_v6 }
 0x195   :  { %1184 = vmatpush3.msra.mxu0 %v310_v28  ;;  %1233 = vmatpush3.msra.mxu1 %v1539_v48 }
 0x196   :  { %1185 = vmatprep.subr.mxu0 %v1330_v6  ;;  %1234 = vmatprep.subr.mxu1 %v1330_v6 }
 0x197   :  { %1186 = vmatpush3.msra.mxu0 %v317_v31  ;;  %1235 = vmatpush3.msra.mxu1 %v1541_v49 }
 0x198   :  { %1187 = vmatprep.subr.mxu0 %v1330_v6  ;;  %1236 = vmatprep.subr.mxu1 %v1330_v6 }
 0x199   :  { %1188 = vmatpush3.msra.mxu0 %v324_v55  ;;  %1237 = vmatpush3.msra.mxu1 %v1544_v50 }
 0x19a   :  { %1238 = vmatprep.mubr.msk.f32.mxu1 %vm1331_vm0, %v1330_v6  ;;  %1189 = vmatprep.subr.mxu0 %v1330_v6 }
 0x19b   :  { %1239 = vmatmul.mubr.f32.vlgmr.msra.gmra.mxu1 %v1611_v21  ;;  %1190 = vmatpush3.msra.mxu0 %v1853_v7 }
 0x19c   :  { %1191 = vmatprep.subr.mxu0 %v1330_v6  ;;  %1241 = vmatprep.mubr.msk.f32.mxu1 %vm1331_vm0, %v1330_v6 }
 0x19d   :  { %1192 = vmatpush3.msra.mxu0 %v1854_v8  ;;  %1197 = vmatprep.mubr.msk.f32.mxu0 %vm1331_vm0, %v1330_v6 }
 0x19e   :  { %1193 = vmatprep.subr.mxu0 %v1330_v6 }
 0x19f   :  { %1242 = vmatmul.mubr.f32.gmra.mxu1 %v1625_v60  ;;  %1194 = vmatpush3.msra.mxu0 %v1855_v9 }
 0x1a0   :  { %1195 = vmatprep.subr.mxu0 %v1330_v6  ;;  %1244 = vmatprep.mubr.msk.f32.mxu1 %vm1331_vm0, %v1330_v6 }
 0x1a1   :  { %1196 = vmatpush3.msra.mxu0 %v1856_v10 }
 0x1a2   :  { %1198 = vmatmul.mubr.f32.vlgmr.msra.gmra.mxu0 %v1611_v21 }
 0x1a3   :  { %1245 = vmatmul.mubr.f32.gmra.mxu1 %v1622_v32  ;;  %1200 = vmatprep.mubr.msk.f32.mxu0 %vm1331_vm0, %v1330_v6 }
 0x1a6   :  { %1201 = vmatmul.mubr.f32.gmra.mxu0 %v1625_v60 }
 0x1a7   :  { %1203 = vmatprep.mubr.msk.f32.mxu0 %vm1331_vm0, %v1330_v6 }
 0x1aa   :  { %1204 = vmatmul.mubr.f32.gmra.mxu0 %v1622_v32 }
 0x211   :  { %v391_v11 = vpop.f32.mrf.mxu1 }
 0x213   :  { %v1076_v12 = vpop.f32.mrf.mxu1 }
 0x216   :  { %v397_v13 = vpop.f32.mrf.mxu1 }
 0x218   :  { %v1079_v15 = vpop.f32.mrf.mxu1 }
 0x219   :  { %v220_v34 = vpop.f32.mrf.mxu0 }
 0x21a   :  { %v221_v37 = vadd.f32 %v886_v14, %v220_v34  ;;  %v403_v38 = vpop.f32.mrf.mxu1 }
 0x21b   :  { %v1035_v39 = vpop.f32.mrf.mxu0 }
 0x21c   :  { %v1082_v40 = vpop.f32.mrf.mxu1  ;;  %v392_v42 = vadd.f32 %v391_v11, %v221_v37 }
 0x21f   :  { %v230_v44 = vpop.f32.mrf.mxu0 }
 0x220   :  { %v231_v24 = vadd.f32 %v886_v14, %v230_v44 }
 0x221   :  { %v1038_v46 = vpop.f32.mrf.mxu0 }
 0x222   :  { %v398_v35 = vadd.f32 %v397_v13, %v231_v24 }
 0x224   :  { %v240_v47 = vpop.f32.mrf.mxu0 }
 0x225   :  { %v241_v33 = vadd.f32 %v886_v14, %v240_v47 }
 0x226   :  { %v1041_v6 = vpop.f32.mrf.mxu0 }
 0x227   :  { %v404_v61 = vadd.f32 %v403_v38, %v241_v33 }
 0x235   :  { %v610_v51 = vpop.f32.mrf.mxu1 }
 0x237   :  { %v1158_v52 = vpop.f32.mrf.mxu1 }
 0x23a   :  { %v618_v53 = vpop.f32.mrf.mxu1 }
 0x23c   :  { %v1161_v57 = vpop.f32.mrf.mxu1 }
 0x23f   :  { %v507_v58 = vpop.f32.mrf.mxu0  ;;  %v626_v59 = vpop.f32.mrf.mxu1 }
 0x240   :  { %v508_v28 = vadd.f32 %v507_v58, %v392_v42 }
 0x241   :  { %v1117_v63 = vpop.f32.mrf.mxu0  ;;  %v1164_v3 = vpop.f32.mrf.mxu1 }
 0x242   :  { %v611_v55 = vadd.f32 %v610_v51, %v508_v28 }
 0x244   :  { %v514_v4 = vpop.f32.mrf.mxu0 }
 0x245   :  { %v515_v49 = vadd.f32 %v514_v4, %v398_v35 }
 0x246   :  { %v1120_v18 = vpop.f32.mrf.mxu0 }
 0x247   :  { %v619_v32 = vadd.f32 %v618_v53, %v515_v49 }
 0x249   :  { %v521_v19 = vpop.f32.mrf.mxu0 }
 0x24a   :  { %v522_v26 = vadd.f32 %v521_v19, %v404_v61 }
 0x24b   :  { %v1123_v20 = vpop.f32.mrf.mxu0 }
 0x24c   :  { %v627_v29 = vadd.f32 %v626_v59, %v522_v26 }
 0x25b   :  { %v844_v25 = vpop.f32.mrf.mxu1 }
 0x25d   :  { %v1240_v31 = vpop.f32.mrf.mxu1 }
 0x25f   :  { %v850_v48 = vpop.f32.mrf.mxu1 }
 0x261   :  { %v1243_v50 = vpop.f32.mrf.mxu1 }
 0x262   :  { %v745_v56 = vpop.f32.mrf.mxu0 }
 0x263   :  { %v746_v62 = vadd.f32 %v745_v56, %v611_v55  ;;  %v856_v5 = vpop.f32.mrf.mxu1 }
 0x264   :  { %v1199_v21 = vpop.f32.mrf.mxu0 }
 0x265   :  { %v845_v16 = vadd.f32 %v844_v25, %v746_v62  ;;  %v1246_v27 = vpop.f32.mrf.mxu1 }
 0x266   :  { %v751_v60 = vpop.f32.mrf.mxu0 }
 0x267   :  { %v860_v30 = vadd.f32 %v845_v16, %v1380_v0  ;;  %v752_v17 = vadd.f32 %v751_v60, %v619_v32 }
 0x268   :  { %v1202_v36 = vpop.f32.mrf.mxu0 }
 0x269   :  { %863 = vst [vmem:[#allocation8] sm:$0xff] %v860_v30  ;;  %v851_v41 = vadd.f32 %v850_v48, %v752_v17 }
 0x26a   :  { %v757_v45 = vpop.f32.mrf.mxu0 }
 0x26b   :  { %v861_v22 = vadd.f32 %v851_v41, %v1386_v2  ;;  %v758_v23 = vadd.f32 %v757_v45, %v627_v29 }
 0x26c   :  { %v1205_v43 = vpop.f32.mrf.mxu0 }
 0x26d   :  { %864 = vst [vmem:[#allocation8 + $0x8] sm:$0xff] %v861_v22  ;;  %v857_v54 = vadd.f32 %v856_v5, %v758_v23 }
 0x26f   :  { %v862_v7 = vadd.f32 %v857_v54, %v1382_v1 }
 0x271   :  { %865 = vst [vmem:[#allocation8 + $0x10] sm:$0xff] %v862_v7 }
 0x272   :  { %1311 = shalt.err (!%p1308_p0)
}
 0x273   :  { %877 = dma.vmem_to_hbm [thread:$0]  %s872_s10, 384, %s1848_s6, [#allocation5], %s1327_s24, %s1327_s24, %s1328_s25  }
 0x274   :  { %1324 = dma.done.wait [#allocation5], 384  }
 0x275   :  { %1325 = vsyncadd [#allocation5], 4294966912 }
 0x276   :  { %881 = vsyncpa [#allocation4], 1 }
 0x277   :  { %882 = vsyncpa [#allocation7], 1 }
 0x278   :  { %883 = vsyncpa [#allocation5], 1 }

</bundles_post_ra>
